<compile_context>
chip_gen: v7x
topology: tpu7x:2x2x1
jax: 0.10.0
libtpu: 0.0.40
codegen_flags: <defaults>
</compile_context>

<pallas_src>
import jax
import jax.numpy as jnp
from jax.experimental import pallas as pl
from jax.experimental.pallas import tpu as pltpu

# ----------------------------- model sizes (small stand-in) ------------------
B = 2                               # batch
CIN, H_IMG, W_IMG = 3, 32, 32       # camera (stand-in for 456x456x3)
K, STRIDE, PAD = 3, 2, 1            # conv stem
COUT = 8                            # stem output channels
OH = (H_IMG + 2 * PAD - K) // STRIDE + 1
OW = (W_IMG + 2 * PAD - K) // STRIDE + 1
OHW = OH * OW                       # 256  (lane-dense spatial axis)
KKC = K * K * CIN                   # 27   (conv contraction, (kh, kw, cin))
KKC_PAD = 32                        # padded contraction (multiple of 8)
OBS_DIM = 3 + 3 + 3 + 4 + 4         # 17: position, velocity, ypr, contacts, sliding
HIDDEN = 30                         # AutoNCP(30, 2): 30 units
XH_PAD = 64                         # packed [obs(17) | h(30)] padded to 64
VIS_DIM = COUT * OHW                # 2048 (torch NCHW .view(B,-1) length)
D_IN = OBS_DIM + VIS_DIM            # 2065 (conceptual CfC input size)
HSTRIDE = 32                        # per-gate lane stride (HIDDEN padded to 32)
NGATES = 4                          # ff1, ff2, time_a, time_b
GP = NGATES * HSTRIDE               # 128 merged-gate lanes -> one MXU pass
HP = HSTRIDE                        # padded hidden width inside the kernel
ACT_DIM = 2                         # 2 motor neurons

VMEM = pl.BlockSpec(memory_space=pltpu.MemorySpace.VMEM)

# advisory cost estimate (helps XLA schedule around the custom call)
_FLOPS = 2 * (COUT * KKC_PAD * B * OHW) + 2 * (B * VIS_DIM * GP) + 2 * (B * XH_PAD * GP)
_TRANS = COUT * B * OHW + 3 * B * HSTRIDE
_BYTES = (B * XH_PAD * 4 + KKC_PAD * B * OHW * 4 + COUT * KKC_PAD * 2 + COUT * 4
          + XH_PAD * GP * 2 + VIS_DIM * GP * 2 + GP * 4 + B * HP * 4)


# ----------------------------- fused Pallas kernel ----------------------------
def actor_fused_kernel(xh_ref, patches_ref, convw_ref, convb_ref,
                       wxh_ref, wxv_ref, bias_ref, hnew_ref, yflat_ref):
    """Fused Actor forward: conv stem (+SiLU) -> dense CfC cell, one kernel.

    xh_ref      (B, XH_PAD)        packed [obs(17) | h(30) | zeros] input
    patches_ref (B*? layout)       (KKC_PAD, B*OHW) im2col patches, /255 applied,
                                   contraction on sublanes, (b, oh, ow) lane-dense
    convw_ref   (COUT, KKC_PAD)    bf16 conv weight^T (pad cols zero)
    convb_ref   (COUT, 1)          f32 conv bias (lane-broadcast column)
    wxh_ref     (XH_PAD, GP)       bf16 merged 4-gate [obs; recurrent] weight
    wxv_ref     (VIS_DIM, GP)      bf16 merged 4-gate vision weight (NCHW order)
    bias_ref    (1, GP)            f32 merged gate bias
    hnew_ref    (B, HP)            new hidden state (motor neurons = lanes 0..1)
    yflat_ref   (B, VIS_DIM)       f32 VMEM scratch: vision embedding staging

    Pad-lane invariant: gate lanes >= HIDDEN within each 32-lane gate slot have
    zero weights AND zero bias, so ff1/ff2 are 0 there and h_new pad lanes stay
    exactly 0 (t_interp is 0.5 on pad lanes but multiplies zeros).
    """
    # (1) obs + recurrent gate contribution + bias: one (B,64)@(64,128) pass.
    gates = jnp.dot(xh_ref[...], wxh_ref[...].astype(jnp.float32),
                    preferred_element_type=jnp.float32) + bias_ref[...]     # (B, GP)

    # (2) conv stem batched over B: one (COUT,32)@(32,B*OHW) matmul, one SiLU.
    y = jnp.dot(convw_ref[...].astype(jnp.float32), patches_ref[...],
                preferred_element_type=jnp.float32) + convb_ref[...]        # (COUT, B*OHW)
    y = y * jax.nn.sigmoid(y)                                               # SiLU

    # (3) Stage into torch NCHW .view(B,-1) order; 16 tiny static, lane-aligned
    #     VMEM stores. The vision embedding never leaves VMEM.
    for bi in range(B):                                                     # static unroll
        for c in range(COUT):
            yflat_ref[bi:bi + 1, c * OHW:(c + 1) * OHW] = \
                y[c:c + 1, bi * OHW:(bi + 1) * OHW]

    # (4) Vision gate contribution: ONE bf16 (B,2048)@(2048,128) MXU pass
    #     (MXU accumulates over K internally; no serialized per-channel adds).
    gates = gates + jnp.dot(yflat_ref[...].astype(jnp.bfloat16), wxv_ref[...],
                            preferred_element_type=jnp.float32)             # (B, GP)

    # (5) Dense CfC cell, single step, ts = 1.0 (ncps default mode uses
    #     t_interp = sigmoid(-time_a * ts + time_b)); vectorized over batch.
    ff1 = jnp.tanh(gates[:, 0 * HSTRIDE:1 * HSTRIDE])
    ff2 = jnp.tanh(gates[:, 1 * HSTRIDE:2 * HSTRIDE])
    t_a = gates[:, 2 * HSTRIDE:3 * HSTRIDE]
    t_b = gates[:, 3 * HSTRIDE:4 * HSTRIDE]
    t_interp = jax.nn.sigmoid(-t_a + t_b)
    hnew_ref[...] = ff1 * (1.0 - t_interp) + t_interp * ff2                 # (B, HP)


# ----------------------------- wrappers (glue) --------------------------------
def _im2col(camera):
    """camera (B, CIN, H, W) raw 0..255 -> (KKC_PAD, B*OHW), /255 applied.

    Rows ordered (kh, kw, cin) to match conv_w.reshape(KKC, COUT); columns
    ordered (b, oh, ow) so the conv output is (COUT, B*OHW) lane-dense.
    """
    cam = camera * (1.0 / 255.0)
    xp = jnp.pad(cam, ((0, 0), (0, 0), (PAD, PAD), (PAD, PAD)))
    ih = (jnp.arange(OH) * STRIDE)[:, None] + jnp.arange(K)[None, :]   # (OH, K)
    iw = (jnp.arange(OW) * STRIDE)[:, None] + jnp.arange(K)[None, :]   # (OW, K)
    p = xp[:, :, ih[:, :, None, None], iw[None, None, :, :]]          # (B,CIN,OH,Kh,OW,Kw)
    p = p.transpose(3, 5, 1, 0, 2, 4).reshape(KKC, B * OHW)           # (kh,kw,cin | b,oh,ow)
    return jnp.pad(p, ((0, KKC_PAD - KKC), (0, 0)))                   # pad 27 -> 32


@jax.jit
def actor_forward(kparams, obs, camera, hx):
    """Actor.forward: vision embedding -> concat with obs -> CfC -> clamp."""
    patches = _im2col(camera)                                   # (32, B*OHW) f32
    xh = jnp.zeros((B, XH_PAD), jnp.float32)                    # packed [obs | h]
    xh = xh.at[:, :OBS_DIM].set(obs)
    xh = xh.at[:, OBS_DIM:OBS_DIM + HIDDEN].set(hx)

    h_new = pl.pallas_call(
        actor_fused_kernel,
        out_shape=jax.ShapeDtypeStruct((B, HP), jnp.float32),
        in_specs=[VMEM] * 7,
        out_specs=VMEM,
        scratch_shapes=[pltpu.VMEM((B, VIS_DIM), jnp.float32)],
        cost_estimate=pl.CostEstimate(flops=_FLOPS, transcendentals=_TRANS,
                                      bytes_accessed=_BYTES),
    )(xh, patches,
      kparams["convw"], kparams["convb"],
      kparams["wxh"], kparams["wxv"], kparams["bias"])

    action = jnp.clip(h_new[:, :ACT_DIM], -1.0, 1.0)            # torch.clamp(action, -1, 1)
    return action, h_new[:, :HIDDEN]


def init_params(key):
    k1, k2, k3, k4, k5 = jax.random.split(key, 5)
    conv_w = jax.random.normal(k1, (K, K, CIN, COUT), jnp.float32) * 0.1
    conv_b = jax.random.normal(k2, (COUT,), jnp.float32) * 0.01
    cfc_wx = jax.random.normal(k3, (NGATES, D_IN, HIDDEN), jnp.float32) * 0.02
    cfc_wh = jax.random.normal(k4, (NGATES, HIDDEN, HIDDEN), jnp.float32) * 0.1
    cfc_b = jax.random.normal(k5, (NGATES, HIDDEN), jnp.float32) * 0.01

    # Weights are stored in bf16 (MXU-native, halves HBM weight traffic).
    # Round the conceptual params to bf16 first so the f32 reference uses the
    # exact same weight values -> tight correctness tolerance stays valid.
    rb = lambda x: x.astype(jnp.bfloat16).astype(jnp.float32)
    conv_w, cfc_wx, cfc_wh = rb(conv_w), rb(cfc_wx), rb(cfc_wh)
    ref = dict(conv_w=conv_w, conv_b=conv_b, cfc_wx=cfc_wx, cfc_wh=cfc_wh, cfc_b=cfc_b)

    # ---- kernel-layout parameters: pad / merge / flatten once, offline ----
    convw = jnp.zeros((COUT, KKC_PAD), jnp.float32)
    convw = convw.at[:, :KKC].set(conv_w.reshape(KKC, COUT).T)
    convb = conv_b.reshape(COUT, 1)

    # merged 4-gate weights: gate g occupies lanes [g*HSTRIDE, g*HSTRIDE + HIDDEN)
    wxh = jnp.zeros((XH_PAD, GP), jnp.float32)     # rows: [obs(17) | h(30) | zero pad]
    wxv = jnp.zeros((VIS_DIM, GP), jnp.float32)    # rows: NCHW-flattened vision features
    bias = jnp.zeros((1, GP), jnp.float32)
    for g in range(NGATES):
        lo = g * HSTRIDE
        wxh = wxh.at[:OBS_DIM, lo:lo + HIDDEN].set(cfc_wx[g, :OBS_DIM, :])
        wxh = wxh.at[OBS_DIM:OBS_DIM + HIDDEN, lo:lo + HIDDEN].set(cfc_wh[g])
        wxv = wxv.at[:, lo:lo + HIDDEN].set(cfc_wx[g, OBS_DIM:, :])
        bias = bias.at[0, lo:lo + HIDDEN].set(cfc_b[g])

    kern = dict(convw=convw.astype(jnp.bfloat16), convb=convb,
                wxh=wxh.astype(jnp.bfloat16), wxv=wxv.astype(jnp.bfloat16),
                bias=bias)
    return ref, kern


def actor_reference(ref, obs, camera, hx):
    """Pure-JAX reference using the original (unfused, unpadded) formulation."""
    cam = camera * (1.0 / 255.0)
    xp = jnp.pad(cam, ((0, 0), (0, 0), (PAD, PAD), (PAD, PAD)))
    ih = (jnp.arange(OH) * STRIDE)[:, None] + jnp.arange(K)[None, :]
    iw = (jnp.arange(OW) * STRIDE)[:, None] + jnp.arange(K)[None, :]
    p = xp[:, :, ih[:, :, None, None], iw[None, None, :, :]]
    p = p.transpose(0, 2, 4, 3, 5, 1).reshape(B * OH * OW, KKC)
    y = p @ ref["conv_w"].reshape(KKC, COUT) + ref["conv_b"]
    y = y * jax.nn.sigmoid(y)                                            # SiLU
    vis = y.reshape(B, OH, OW, COUT).transpose(0, 3, 1, 2).reshape(B, VIS_DIM)
    x = jnp.concatenate([obs, vis], axis=1)
    g = (jnp.einsum("bd,gdh->gbh", x, ref["cfc_wx"])
         + jnp.einsum("bh,ghk->gbk", hx, ref["cfc_wh"])
         + ref["cfc_b"][:, None, :])
    ff1, ff2 = jnp.tanh(g[0]), jnp.tanh(g[1])
    t_interp = jax.nn.sigmoid(-g[2] + g[3])
    h_new = ff1 * (1.0 - t_interp) + t_interp * ff2
    return jnp.clip(h_new[:, :ACT_DIM], -1.0, 1.0), h_new


if __name__ == "__main__":
    key = jax.random.PRNGKey(0)
    k_obs, k_cam, k_params = jax.random.split(key, 3)

    # obs = [position(3), velocity(3), yaw_pitch_roll(3), wheel_contacts(4),
    #        wheel_sliding(4)] -> 17 features; camera raw 0..255 (the /255 from
    # obs_space_to_tensor_concat is applied while building the im2col patches).
    obs = jax.random.normal(k_obs, (B, OBS_DIM), jnp.float32)
    camera = jax.random.uniform(k_cam, (B, CIN, H_IMG, W_IMG), jnp.float32,
                                minval=0.0, maxval=255.0)
    hx = jnp.zeros((B, HIDDEN), jnp.float32)        # self.hx is None -> zeros

    ref_params, kern_params = init_params(k_params)

    action, hx_new = actor_forward(kern_params, obs, camera, hx)
    jax.block_until_ready((action, hx_new))
    # second step re-using the recurrent state (exercises the hx path)
    action2, hx2 = actor_forward(kern_params, obs, camera, hx_new)
    jax.block_until_ready((action2, hx2))

    # correctness vs pure-JAX reference of the original formulation
    a_ref, h_ref = actor_reference(ref_params, obs, camera, hx)
    a_ref2, h_ref2 = actor_reference(ref_params, obs, camera, h_ref)
    assert action.shape == (B, ACT_DIM) and hx_new.shape == (B, HIDDEN)
    assert bool(jnp.all(action <= 1.0)) and bool(jnp.all(action >= -1.0))
    err_a = float(jnp.max(jnp.abs(action - a_ref)))
    err_h = float(jnp.max(jnp.abs(hx_new - h_ref)))
    err_h2 = float(jnp.max(jnp.abs(hx2 - h_ref2)))
    assert err_a < 5e-3 and err_h < 5e-3, (err_a, err_h)
    assert err_h2 < 1e-2, err_h2
    print("KERNEL_OK")
</pallas_src>

<mosaic_0001>
module attributes {stable_mosaic.version = 11 : i64} {
  func.func private @main(%arg0: i32) attributes {dimension_semantics = [#tpu.dimension_semantics<core_parallel>], iteration_bounds = array<i64: 2>, tpu.core_type = #tpu.core_type<sc_scalar_subcore>, window_params = []} {
    return
  }
}

module attributes {stable_mosaic.version = 11 : i64} {
  func.func private @main(%arg0: i32) attributes {dimension_semantics = [#tpu.dimension_semantics<core_parallel>], iteration_bounds = array<i64: 2>, tpu.core_type = #tpu.core_type<sc_scalar_subcore>, window_params = []} {
    return
  }
}

module attributes {stable_mosaic.version = 11 : i64} {
  func.func @actor_fused_kernel(%arg0: memref<2x64xf32, #tpu.memory_space<vmem>>, %arg1: memref<32x512xf32, #tpu.memory_space<vmem>>, %arg2: memref<8x32xbf16, #tpu.memory_space<vmem>>, %arg3: memref<8x1xf32, #tpu.memory_space<vmem>>, %arg4: memref<64x128xbf16, #tpu.memory_space<vmem>>, %arg5: memref<2048x128xbf16, #tpu.memory_space<vmem>>, %arg6: memref<1x128xf32, #tpu.memory_space<vmem>>, %arg7: memref<2x32xf32, #tpu.memory_space<vmem>>, %arg8: memref<2x2048xf32, #tpu.memory_space<vmem>>) attributes {dimension_semantics = [], scalar_prefetch = 0 : i64, scratch_operands = 1 : i64, tpu.core_type = #tpu.core_type<tc>} {
    %c0 = arith.constant 0 : index
    %c0_0 = arith.constant 0 : index
    %0 = vector.load %arg0[%c0, %c0_0] : memref<2x64xf32, #tpu.memory_space<vmem>>, vector<2x64xf32>
    %c0_1 = arith.constant 0 : index
    %c0_2 = arith.constant 0 : index
    %1 = vector.load %arg4[%c0_1, %c0_2] : memref<64x128xbf16, #tpu.memory_space<vmem>>, vector<64x128xbf16>
    %2 = arith.extf %1 : vector<64x128xbf16> to vector<64x128xf32>
    %cst = arith.constant dense<0.000000e+00> : vector<2x128xf32>
    %3 = tpu.matmul %0, %2, %cst {dimension_numbers = #tpu.dot_dimension_numbers<[1], [0], [0], [1], [0, 0, 1, 1], [], []>} : vector<2x64xf32>, vector<64x128xf32>, vector<2x128xf32> -> vector<2x128xf32>
    %c0_3 = arith.constant 0 : index
    %c0_4 = arith.constant 0 : index
    %4 = vector.load %arg6[%c0_3, %c0_4] : memref<1x128xf32, #tpu.memory_space<vmem>>, vector<1x128xf32>
    %5 = vector.broadcast %4 : vector<1x128xf32> to vector<2x128xf32>
    %6 = arith.addf %3, %5 : vector<2x128xf32>
    %c0_5 = arith.constant 0 : index
    %c0_6 = arith.constant 0 : index
    %7 = vector.load %arg2[%c0_5, %c0_6] : memref<8x32xbf16, #tpu.memory_space<vmem>>, vector<8x32xbf16>
    %8 = arith.extf %7 : vector<8x32xbf16> to vector<8x32xf32>
    %c0_7 = arith.constant 0 : index
    %c0_8 = arith.constant 0 : index
    %9 = vector.load %arg1[%c0_7, %c0_8] : memref<32x512xf32, #tpu.memory_space<vmem>>, vector<32x512xf32>
    %cst_9 = arith.constant dense<0.000000e+00> : vector<8x512xf32>
    %10 = tpu.matmul %8, %9, %cst_9 {dimension_numbers = #tpu.dot_dimension_numbers<[1], [0], [0], [1], [0, 0, 1, 1], [], []>} : vector<8x32xf32>, vector<32x512xf32>, vector<8x512xf32> -> vector<8x512xf32>
    %c0_10 = arith.constant 0 : index
    %c0_11 = arith.constant 0 : index
    %11 = vector.load %arg3[%c0_10, %c0_11] : memref<8x1xf32, #tpu.memory_space<vmem>>, vector<8x1xf32>
    %12 = vector.broadcast %11 : vector<8x1xf32> to vector<8x512xf32>
    %13 = arith.addf %10, %12 : vector<8x512xf32>
    %14 = arith.negf %13 : vector<8x512xf32>
    %15 = math.exp %14 : vector<8x512xf32>
    %cst_12 = arith.constant 1.000000e+00 : f32
    %16 = vector.broadcast %cst_12 : f32 to vector<8x512xf32>
    %17 = arith.addf %16, %15 : vector<8x512xf32>
    %18 = arith.divf %16, %17 : vector<8x512xf32>
    %19 = arith.mulf %13, %18 : vector<8x512xf32>
    %20 = vector.extract_strided_slice %19 {offsets = [0, 0], sizes = [1, 256], strides = [1, 1]} : vector<8x512xf32> to vector<1x256xf32>
    %c0_13 = arith.constant 0 : index
    %c0_14 = arith.constant 0 : index
    %21 = vector.load %arg8[%c0_13, %c0_14] : memref<2x2048xf32, #tpu.memory_space<vmem>>, vector<1x256xf32>
    tpu.vector_store %arg8[%c0_13, %c0_14], %20 {strides = array<i32>} : memref<2x2048xf32, #tpu.memory_space<vmem>>, vector<1x256xf32>,
    %22 = vector.extract_strided_slice %19 {offsets = [1, 0], sizes = [1, 256], strides = [1, 1]} : vector<8x512xf32> to vector<1x256xf32>
    %c0_15 = arith.constant 0 : index
    %c256 = arith.constant 256 : index
    %23 = vector.load %arg8[%c0_15, %c256] : memref<2x2048xf32, #tpu.memory_space<vmem>>, vector<1x256xf32>
    tpu.vector_store %arg8[%c0_15, %c256], %22 {strides = array<i32>} : memref<2x2048xf32, #tpu.memory_space<vmem>>, vector<1x256xf32>,
    %24 = vector.extract_strided_slice %19 {offsets = [2, 0], sizes = [1, 256], strides = [1, 1]} : vector<8x512xf32> to vector<1x256xf32>
    %c0_16 = arith.constant 0 : index
    %c512 = arith.constant 512 : index
    %25 = vector.load %arg8[%c0_16, %c512] : memref<2x2048xf32, #tpu.memory_space<vmem>>, vector<1x256xf32>
    tpu.vector_store %arg8[%c0_16, %c512], %24 {strides = array<i32>} : memref<2x2048xf32, #tpu.memory_space<vmem>>, vector<1x256xf32>,
    %26 = vector.extract_strided_slice %19 {offsets = [3, 0], sizes = [1, 256], strides = [1, 1]} : vector<8x512xf32> to vector<1x256xf32>
    %c0_17 = arith.constant 0 : index
    %c768 = arith.constant 768 : index
    %27 = vector.load %arg8[%c0_17, %c768] : memref<2x2048xf32, #tpu.memory_space<vmem>>, vector<1x256xf32>
    tpu.vector_store %arg8[%c0_17, %c768], %26 {strides = array<i32>} : memref<2x2048xf32, #tpu.memory_space<vmem>>, vector<1x256xf32>,
    %28 = vector.extract_strided_slice %19 {offsets = [4, 0], sizes = [1, 256], strides = [1, 1]} : vector<8x512xf32> to vector<1x256xf32>
    %c0_18 = arith.constant 0 : index
    %c1024 = arith.constant 1024 : index
    %29 = vector.load %arg8[%c0_18, %c1024] : memref<2x2048xf32, #tpu.memory_space<vmem>>, vector<1x256xf32>
    tpu.vector_store %arg8[%c0_18, %c1024], %28 {strides = array<i32>} : memref<2x2048xf32, #tpu.memory_space<vmem>>, vector<1x256xf32>,
    %30 = vector.extract_strided_slice %19 {offsets = [5, 0], sizes = [1, 256], strides = [1, 1]} : vector<8x512xf32> to vector<1x256xf32>
    %c0_19 = arith.constant 0 : index
    %c1280 = arith.constant 1280 : index
    %31 = vector.load %arg8[%c0_19, %c1280] : memref<2x2048xf32, #tpu.memory_space<vmem>>, vector<1x256xf32>
    tpu.vector_store %arg8[%c0_19, %c1280], %30 {strides = array<i32>} : memref<2x2048xf32, #tpu.memory_space<vmem>>, vector<1x256xf32>,
    %32 = vector.extract_strided_slice %19 {offsets = [6, 0], sizes = [1, 256], strides = [1, 1]} : vector<8x512xf32> to vector<1x256xf32>
    %c0_20 = arith.constant 0 : index
    %c1536 = arith.constant 1536 : index
    %33 = vector.load %arg8[%c0_20, %c1536] : memref<2x2048xf32, #tpu.memory_space<vmem>>, vector<1x256xf32>
    tpu.vector_store %arg8[%c0_20, %c1536], %32 {strides = array<i32>} : memref<2x2048xf32, #tpu.memory_space<vmem>>, vector<1x256xf32>,
    %34 = vector.extract_strided_slice %19 {offsets = [7, 0], sizes = [1, 256], strides = [1, 1]} : vector<8x512xf32> to vector<1x256xf32>
    %c0_21 = arith.constant 0 : index
    %c1792 = arith.constant 1792 : index
    %35 = vector.load %arg8[%c0_21, %c1792] : memref<2x2048xf32, #tpu.memory_space<vmem>>, vector<1x256xf32>
    tpu.vector_store %arg8[%c0_21, %c1792], %34 {strides = array<i32>} : memref<2x2048xf32, #tpu.memory_space<vmem>>, vector<1x256xf32>,
    %36 = vector.extract_strided_slice %19 {offsets = [0, 256], sizes = [1, 256], strides = [1, 1]} : vector<8x512xf32> to vector<1x256xf32>
    %c1 = arith.constant 1 : index
    %c0_22 = arith.constant 0 : index
    %37 = vector.load %arg8[%c1, %c0_22] : memref<2x2048xf32, #tpu.memory_space<vmem>>, vector<1x256xf32>
    tpu.vector_store %arg8[%c1, %c0_22], %36 {strides = array<i32>} : memref<2x2048xf32, #tpu.memory_space<vmem>>, vector<1x256xf32>,
    %38 = vector.extract_strided_slice %19 {offsets = [1, 256], sizes = [1, 256], strides = [1, 1]} : vector<8x512xf32> to vector<1x256xf32>
    %c1_23 = arith.constant 1 : index
    %c256_24 = arith.constant 256 : index
    %39 = vector.load %arg8[%c1_23, %c256_24] : memref<2x2048xf32, #tpu.memory_space<vmem>>, vector<1x256xf32>
    tpu.vector_store %arg8[%c1_23, %c256_24], %38 {strides = array<i32>} : memref<2x2048xf32, #tpu.memory_space<vmem>>, vector<1x256xf32>,
    %40 = vector.extract_strided_slice %19 {offsets = [2, 256], sizes = [1, 256], strides = [1, 1]} : vector<8x512xf32> to vector<1x256xf32>
    %c1_25 = arith.constant 1 : index
    %c512_26 = arith.constant 512 : index
    %41 = vector.load %arg8[%c1_25, %c512_26] : memref<2x2048xf32, #tpu.memory_space<vmem>>, vector<1x256xf32>
    tpu.vector_store %arg8[%c1_25, %c512_26], %40 {strides = array<i32>} : memref<2x2048xf32, #tpu.memory_space<vmem>>, vector<1x256xf32>,
    %42 = vector.extract_strided_slice %19 {offsets = [3, 256], sizes = [1, 256], strides = [1, 1]} : vector<8x512xf32> to vector<1x256xf32>
    %c1_27 = arith.constant 1 : index
    %c768_28 = arith.constant 768 : index
    %43 = vector.load %arg8[%c1_27, %c768_28] : memref<2x2048xf32, #tpu.memory_space<vmem>>, vector<1x256xf32>
    tpu.vector_store %arg8[%c1_27, %c768_28], %42 {strides = array<i32>} : memref<2x2048xf32, #tpu.memory_space<vmem>>, vector<1x256xf32>,
    %44 = vector.extract_strided_slice %19 {offsets = [4, 256], sizes = [1, 256], strides = [1, 1]} : vector<8x512xf32> to vector<1x256xf32>
    %c1_29 = arith.constant 1 : index
    %c1024_30 = arith.constant 1024 : index
    %45 = vector.load %arg8[%c1_29, %c1024_30] : memref<2x2048xf32, #tpu.memory_space<vmem>>, vector<1x256xf32>
    tpu.vector_store %arg8[%c1_29, %c1024_30], %44 {strides = array<i32>} : memref<2x2048xf32, #tpu.memory_space<vmem>>, vector<1x256xf32>,
    %46 = vector.extract_strided_slice %19 {offsets = [5, 256], sizes = [1, 256], strides = [1, 1]} : vector<8x512xf32> to vector<1x256xf32>
    %c1_31 = arith.constant 1 : index
    %c1280_32 = arith.constant 1280 : index
    %47 = vector.load %arg8[%c1_31, %c1280_32] : memref<2x2048xf32, #tpu.memory_space<vmem>>, vector<1x256xf32>
    tpu.vector_store %arg8[%c1_31, %c1280_32], %46 {strides = array<i32>} : memref<2x2048xf32, #tpu.memory_space<vmem>>, vector<1x256xf32>,
    %48 = vector.extract_strided_slice %19 {offsets = [6, 256], sizes = [1, 256], strides = [1, 1]} : vector<8x512xf32> to vector<1x256xf32>
    %c1_33 = arith.constant 1 : index
    %c1536_34 = arith.constant 1536 : index
    %49 = vector.load %arg8[%c1_33, %c1536_34] : memref<2x2048xf32, #tpu.memory_space<vmem>>, vector<1x256xf32>
    tpu.vector_store %arg8[%c1_33, %c1536_34], %48 {strides = array<i32>} : memref<2x2048xf32, #tpu.memory_space<vmem>>, vector<1x256xf32>,
    %50 = vector.extract_strided_slice %19 {offsets = [7, 256], sizes = [1, 256], strides = [1, 1]} : vector<8x512xf32> to vector<1x256xf32>
    %c1_35 = arith.constant 1 : index
    %c1792_36 = arith.constant 1792 : index
    %51 = vector.load %arg8[%c1_35, %c1792_36] : memref<2x2048xf32, #tpu.memory_space<vmem>>, vector<1x256xf32>
    tpu.vector_store %arg8[%c1_35, %c1792_36], %50 {strides = array<i32>} : memref<2x2048xf32, #tpu.memory_space<vmem>>, vector<1x256xf32>,
    %c0_37 = arith.constant 0 : index
    %c0_38 = arith.constant 0 : index
    %52 = vector.load %arg8[%c0_37, %c0_38] : memref<2x2048xf32, #tpu.memory_space<vmem>>, vector<2x2048xf32>
    %53 = arith.truncf %52 : vector<2x2048xf32> to vector<2x2048xbf16>
    %c0_39 = arith.constant 0 : index
    %c0_40 = arith.constant 0 : index
    %54 = vector.load %arg5[%c0_39, %c0_40] : memref<2048x128xbf16, #tpu.memory_space<vmem>>, vector<2048x128xbf16>
    %cst_41 = arith.constant dense<0.000000e+00> : vector<2x128xf32>
    %55 = tpu.matmul %53, %54, %cst_41 {dimension_numbers = #tpu.dot_dimension_numbers<[1], [0], [0], [1], [0, 0, 1, 1], [], []>} : vector<2x2048xbf16>, vector<2048x128xbf16>, vector<2x128xf32> -> vector<2x128xf32>
    %56 = arith.addf %6, %55 : vector<2x128xf32>
    %57 = vector.extract_strided_slice %56 {offsets = [0, 0], sizes = [2, 32], strides = [1, 1]} : vector<2x128xf32> to vector<2x32xf32>
    %58 = math.tanh %57 : vector<2x32xf32>
    %59 = vector.extract_strided_slice %56 {offsets = [0, 32], sizes = [2, 32], strides = [1, 1]} : vector<2x128xf32> to vector<2x32xf32>
    %60 = math.tanh %59 : vector<2x32xf32>
    %61 = vector.extract_strided_slice %56 {offsets = [0, 64], sizes = [2, 32], strides = [1, 1]} : vector<2x128xf32> to vector<2x32xf32>
    %62 = vector.extract_strided_slice %56 {offsets = [0, 96], sizes = [2, 32], strides = [1, 1]} : vector<2x128xf32> to vector<2x32xf32>
    %cst_42 = arith.constant 0.000000e+00 : f32
    %63 = vector.broadcast %cst_42 : f32 to vector<2x32xf32>
    %64 = arith.subf %63, %61 : vector<2x32xf32>
    %65 = arith.addf %64, %62 : vector<2x32xf32>
    %66 = arith.negf %65 : vector<2x32xf32>
    %67 = math.exp %66 : vector<2x32xf32>
    %cst_43 = arith.constant 1.000000e+00 : f32
    %68 = vector.broadcast %cst_43 : f32 to vector<2x32xf32>
    %69 = arith.addf %68, %67 : vector<2x32xf32>
    %70 = arith.divf %68, %69 : vector<2x32xf32>
    %cst_44 = arith.constant 1.000000e+00 : f32
    %71 = vector.broadcast %cst_44 : f32 to vector<2x32xf32>
    %72 = arith.subf %71, %70 : vector<2x32xf32>
    %73 = arith.mulf %58, %72 : vector<2x32xf32>
    %74 = arith.mulf %70, %60 : vector<2x32xf32>
    %75 = arith.addf %73, %74 : vector<2x32xf32>
    %c0_45 = arith.constant 0 : index
    %c0_46 = arith.constant 0 : index
    %76 = vector.load %arg7[%c0_45, %c0_46] : memref<2x32xf32, #tpu.memory_space<vmem>>, vector<2x32xf32>
    tpu.vector_store %arg7[%c0_45, %c0_46], %75 {strides = array<i32>} : memref<2x32xf32, #tpu.memory_space<vmem>>, vector<2x32xf32>,
    return
  }
}

</mosaic_0001>

<bundles_post_ra>
// kernel: actor_forward.1
= control target key start
LH: loop header
LB: loop body
LE: loop exit
PB: predicated region body
PF: predicated region fallthrough
CT: control target
= control target key end

     0   :  { %v2518_v3 = vmov 0.0   ;;  %v2519_v4 = vmov 0   ;;  %vm149_vm0 = vcmask 261120   ;;  %v2520_v29 = vmov 0.0|0.0   ;;  %s2525_s26 = smov 32   ;;  %s3111_s1 = inlined_call_operand.vmem [shape: f32[32,512], index: 1, kind: input, shape index: {}]   ;;  %s3112_s2 = inlined_call_operand.vmem [shape: bf16[8,32], index: 2, kind: input, shape index: {}]   ;;  %s3113_s3 = inlined_call_operand.vmem [shape: f32[8,1], index: 3, kind: input, shape index: {}]   ;;  %s3114_s4 = inlined_call_operand.vmem [shape: bf16[64,128], index: 4, kind: input, shape index: {}]   ;;  %s3115_s5 = inlined_call_operand.vmem [shape: bf16[2048,128], index: 5, kind: input, shape index: {}]   ;;  %s3116_s0 = inlined_call_operand.vmem [shape: f32[2,64], index: 0, kind: input, shape index: {}]   ;;  %s3117_s6 = inlined_call_operand.vmem [shape: f32[1,128], index: 6, kind: input, shape index: {}]   ;;  %s3118_s7 = inlined_call_operand.vmem [shape: f32[2,32], index: 7, kind: output, shape index: {}]  }
   0x1   :  { %v128_v0 = vld [vmem:[%s3111_s1 + $0x8] sm:$0xff]  ;;  %v127_v2 = vld [vmem:[%s3111_s1] sm:$0xff]  ;;  %217 = vmatprep.mubr.f32.mxu1 %v2518_v3  ;;  %2363 = vset.pattern.permute.xlu0 %v2519_v4  ;;  %v130_v13 = vld [vmem:[%s3111_s1 + $0x18] sm:$0xff]  ;;  %vm2521_vm1 = vmmov 0   ;;  %vm51_vm2 = vcmask 523264   ;;  %vm1960_vm4 = vcmask 254976  }
   0x2   :  { %v132_v1 = vld [vmem:[%s3111_s1 + $0x28] sm:$0xff]  ;;  %v131_v6 = vld [vmem:[%s3111_s1 + $0x20] sm:$0xff]  ;;  %v134_v14 = vld [vmem:[%s3111_s1 + $0x38] sm:$0xff]  ;;  %2326 = vmatprep.subr.bf16.mxu0 %v2520_v29  ;;  %2323 = vmatprep.mubr.msk.f32.mxu0 %vm2521_vm1, %v2518_v3 }
   0x3   :  { %v2338_v5 = vpack.c.bf16 %v132_v1, %v128_v0  ;;  %v136_v7 = vld [vmem:[%s3111_s1 + $0x48] sm:$0xff]  ;;  %v2340_v9 = vpack.c.bf16 %v131_v6, %v127_v2  ;;  %v135_v11 = vld [vmem:[%s3111_s1 + $0x40] sm:$0xff]  ;;  %v2346_v17 = vpack.c.bf16 %v134_v14, %v130_v13  ;;  %v129_v18 = vld [vmem:[%s3111_s1 + $0x10] sm:$0xff] }
   0x4   :  { %v140_v8 = vld [vmem:[%s3111_s1 + $0x68] sm:$0xff]  ;;  %v139_v12 = vld [vmem:[%s3111_s1 + $0x60] sm:$0xff]  ;;  %v133_v19 = vld [vmem:[%s3111_s1 + $0x30] sm:$0xff] }
   0x5   :  { %v2342_v10 = vpack.c.bf16 %v140_v8, %v136_v7  ;;  %2339 = vmatprep.subr.bf16.mxu1 %v2338_v5  ;;  %v2344_v15 = vpack.c.bf16 %v139_v12, %v135_v11  ;;  %v125_v16 = vld [vmem:[%s3112_s2] sm:$0xf]  ;;  %v138_v21 = vld [vmem:[%s3111_s1 + $0x58] sm:$0xff]  ;;  %v2348_v24 = vpack.c.bf16 %v133_v19, %v129_v18  ;;  %v137_v26 = vld [vmem:[%s3111_s1 + $0x50] sm:$0xff] }
   0x6   :  { %2341 = vmatpush1.bf16.msra.mxu1 %v2340_v9  ;;  %v143_v20 = vld [vmem:[%s3113_s3] sm:$0xff]  ;;  %v142_v22 = vld [vmem:[%s3111_s1 + $0x78] sm:$0xff]  ;;  %v126_v23 = vunpack.c.l.bf16 %v125_v16  ;;  %v141_v27 = vld [vmem:[%s3111_s1 + $0x70] sm:$0xff] }
   0x7   :  { %2343 = vmatprep.subr.bf16.mxu1 %v2342_v10  ;;  %146 = vperm.xlu0 %2363, %v143_v20   ;;  %v2350_v25 = vpack.c.bf16 %v142_v22, %v138_v21  ;;  %v2352_v28 = vpack.c.bf16 %v141_v27, %v137_v26  ;;  %v2104_v30 = vld [vmem:[%s3114_s4] sm:$0xff]   ;;  %v2119_v31 = vld [vmem:[%s3114_s4 + $0x8] sm:$0xff]   ;;  %v2120_v32 = vld [vmem:[%s3114_s4 + $0x10] sm:$0xff]   ;;  %v2522_v22 = vmov 1966171168  }
   0x8   :  { %2328 = vmatpush3.bf16.msra.mxu0 %v2104_v30  ;;  %v2121_v33 = vld [vmem:[%s3114_s4 + $0x18] sm:$0xff]   ;;  %v2364_v34 = vld [vmem:[%s3115_s5 + $0x40] sm:$0xff]   ;;  %v2368_v39 = vld [vmem:[%s3115_s5 + $0x48] sm:$0xff]   ;;  %s2524_s4 = smov 96  }
   0x9   :  { %2329 = vmatprep.subr.bf16.mxu0 %v2520_v29  ;;  %v27_v35 = vld [vmem:[%s3116_s0] sm:$0x3]  ;;  %v2369_v40 = vld [vmem:[%s3115_s5 + $0x8] sm:$0xff]   ;;  %v2372_v43 = vld [vmem:[%s3115_s5 + $0x50] sm:$0xff]  }
   0xa   :  { %2345 = vmatpush1.bf16.msra.mxu1 %v2344_v15  ;;  %v2365_v36 = vld [vmem:[%s3115_s5] sm:$0xff]   ;;  %v2370_v41 = vld [vmem:[%s3115_s5 + $0xc8] sm:$0xff]   ;;  %v2373_v44 = vld [vmem:[%s3115_s5 + $0x10] sm:$0xff]  }
   0xb   :  { %2347 = vmatprep.subr.bf16.mxu1 %v2346_v17  ;;  %v2366_v37 = vld [vmem:[%s3115_s5 + $0xc0] sm:$0xff]   ;;  %v2371_v42 = vld [vmem:[%s3115_s5 + $0x88] sm:$0xff]   ;;  %v2374_v45 = vld [vmem:[%s3115_s5 + $0xd0] sm:$0xff]  }
   0xc   :  { %2331 = vmatpush3.bf16.msra.mxu0 %v2119_v31  ;;  %v2367_v38 = vld [vmem:[%s3115_s5 + $0x80] sm:$0xff]   ;;  %v2375_v46 = vld [vmem:[%s3115_s5 + $0x90] sm:$0xff]   ;;  %v2376_v47 = vld [vmem:[%s3115_s5 + $0x58] sm:$0xff]  }
   0xd   :  { %1968 = vmatmul.mubr.msk.f32.vlgmr.msra.gmra.mrb[0].mxu1 %vm149_vm0, %v126_v23  ;;  %2332 = vmatprep.subr.bf16.mxu0 %v2520_v29  ;;  %v2377_v48 = vld [vmem:[%s3115_s5 + $0x18] sm:$0xff]   ;;  %v2380_v51 = vld [vmem:[%s3115_s5 + $0x60] sm:$0xff]   ;;  %v2384_v55 = vld [vmem:[%s3115_s5 + $0x68] sm:$0xff]  }
   0xe   :  { %2349 = vmatpush1.bf16.msra.mxu1 %v2348_v24  ;;  %288 = vmatprep.mubr.f32.mxu1 %v2518_v3  ;;  %v2378_v49 = vld [vmem:[%s3115_s5 + $0xd8] sm:$0xff]   ;;  %v2381_v52 = vld [vmem:[%s3115_s5 + $0x20] sm:$0xff]   ;;  %v2385_v56 = vld [vmem:[%s3115_s5 + $0x28] sm:$0xff]   ;;  %v329_v24 = vlaneseq }
   0xf   :  { %2351 = vmatprep.subr.bf16.mxu1 %v2350_v25  ;;  %v2379_v50 = vld [vmem:[%s3115_s5 + $0x98] sm:$0xff]   ;;  %v2382_v53 = vld [vmem:[%s3115_s5 + $0xe0] sm:$0xff]   ;;  %v2386_v57 = vld [vmem:[%s3115_s5 + $0xe8] sm:$0xff]  }
  0x10   :  { %2334 = vmatpush3.bf16.msra.mxu0 %v2120_v32  ;;  %v2383_v54 = vld [vmem:[%s3115_s5 + $0xa0] sm:$0xff]   ;;  %v2387_v58 = vld [vmem:[%s3115_s5 + $0xa8] sm:$0xff]   ;;  %v2388_v59 = vld [vmem:[%s3115_s5 + $0x70] sm:$0xff]   ;;  %v330_v30 = vshrl.u32 %v329_v24, 7  ;;  %vm2738_vm3 = vcmp.lt.s32.totalorder %v329_v24, 256 }
  0x11   :  { %2335 = vmatprep.subr.bf16.mxu0 %v2520_v29  ;;  %v2389_v60 = vld [vmem:[%s3115_s5 + $0x30] sm:$0xff]   ;;  %v2392_v63 = vld [vmem:[%s3115_s5 + $0x78] sm:$0xff]   ;;  %v2396_v3 = vld [vmem:[%s3115_s5 + $0x140] sm:$0xff]  }
  0x12   :  { %2353 = vmatpush1.bf16.msra.mxu1 %v2352_v28  ;;  %v2390_v61 = vld [vmem:[%s3115_s5 + $0xf0] sm:$0xff]   ;;  %v2393_v0 = vld [vmem:[%s3115_s5 + $0x38] sm:$0xff]   ;;  %v2399_v4 = vld [vmem:[%s3115_s5 + $0x1c0] sm:$0xff]  }
  0x13   :  { %2153 = vmatprep.subr.bf16.mxu1 %v2366_v37  ;;  %v2391_v62 = vld [vmem:[%s3115_s5 + $0xb0] sm:$0xff]   ;;  %v2394_v1 = vld [vmem:[%s3115_s5 + $0xf8] sm:$0xff]  }
  0x14   :  { %2337 = vmatpush3.bf16.msra.mxu0 %v2121_v33  ;;  %v2395_v2 = vld [vmem:[%s3115_s5 + $0xb8] sm:$0xff]  }
  0x15   :  { %1969 = vmatmul.mubr.msk.f32.vlgmr.msra.gmra.mrb[2].mxu1 %vm149_vm0, %v126_v23  ;;  %2131 = vmatprep.subr.bf16.mxu0 %v2364_v34  ;;  %v327_v23 = vunpack.c.l.s4 %v2522_v22 }
  0x16   :  { %2154 = vmatpush3.bf16.msra.mxu1 %v2367_v38 }
  0x17   :  { %2324 = vmatmul.mubr.msk.f32.vlgmr.msra.gmra.mrb[0].mxu0 %vm51_vm2, %v27_v35  ;;  %2155 = vmatprep.subr.bf16.mxu1 %v2370_v41  ;;  %v328_v29 = vunpack.c.0.s8 %v327_v23 }
  0x18   :  { %2132 = vmatpush3.bf16.msra.mxu0 %v2365_v36 }
  0x19   :  { %2133 = vmatprep.subr.bf16.mxu0 %v2368_v39  ;;  %v331_v35 = vsub.s32 %v328_v29, %v330_v30  ;;  %v2404_v29 = vld [vmem:[%s3115_s5 + $0x1c8] sm:$0xff]  }
  0x1a   :  { %2156 = vmatpush3.bf16.msra.mxu1 %v2371_v42 }
  0x1b   :  { %2157 = vmatprep.subr.bf16.mxu1 %v2374_v45 }
  0x1c   :  { %2134 = vmatpush3.bf16.msra.mxu0 %v2369_v40  ;;  %v2414_v40 = vld [vmem:[%s3115_s5 + $0x160] sm:$0xff]  }
  0x1d   :  { %2135 = vmatprep.subr.bf16.mxu0 %v2372_v43 }
  0x1e   :  { %2158 = vmatpush3.bf16.msra.mxu1 %v2375_v46 }
  0x1f   :  { %2159 = vmatprep.subr.bf16.mxu1 %v2378_v49 }
  0x20   :  { %2136 = vmatpush3.bf16.msra.mxu0 %v2373_v44 }
  0x21   :  { %2137 = vmatprep.subr.bf16.mxu0 %v2376_v47 }
  0x22   :  { %2160 = vmatpush3.bf16.msra.mxu1 %v2379_v50 }
  0x23   :  { %2161 = vmatprep.subr.bf16.mxu1 %v2382_v53 }
  0x24   :  { %2138 = vmatpush3.bf16.msra.mxu0 %v2377_v48 }
  0x25   :  { %2139 = vmatprep.subr.bf16.mxu0 %v2380_v51 }
  0x26   :  { %2162 = vmatpush3.bf16.msra.mxu1 %v2383_v54 }
  0x27   :  { %2163 = vmatprep.subr.bf16.mxu1 %v2386_v57 }
  0x28   :  { %2140 = vmatpush3.bf16.msra.mxu0 %v2381_v52 }
  0x29   :  { %2141 = vmatprep.subr.bf16.mxu0 %v2384_v55 }
  0x2a   :  { %2164 = vmatpush3.bf16.msra.mxu1 %v2387_v58 }
  0x2b   :  { %2165 = vmatprep.subr.bf16.mxu1 %v2390_v61 }
  0x2c   :  { %2142 = vmatpush3.bf16.msra.mxu0 %v2385_v56 }
  0x2d   :  { %2143 = vmatprep.subr.bf16.mxu0 %v2388_v59  ;;  %v2523_v59 = vmov 1983009808  }
  0x2e   :  { %2166 = vmatpush3.bf16.msra.mxu1 %v2391_v62 }
  0x2f   :  { %2167 = vmatprep.subr.bf16.mxu1 %v2394_v1 }
  0x30   :  { %2144 = vmatpush3.bf16.msra.mxu0 %v2389_v60  ;;  %v488_v60 = vunpack.c.l.s4 %v2523_v59 }
  0x31   :  { %2145 = vmatprep.subr.bf16.mxu0 %v2392_v63 }
  0x32   :  { %2168 = vmatpush3.bf16.msra.mxu1 %v2395_v2 }
  0x33   :  { %2197 = vmatprep.subr.bf16.mxu1 %v2399_v4 }
  0x34   :  { %2146 = vmatpush3.bf16.msra.mxu0 %v2393_v0 }
  0x35   :  { %2175 = vmatprep.subr.bf16.mxu0 %v2396_v3 }
  0x86   :  { %v147_v5 = vpop.permute.xlu0 %146 }
  0xe0   :  { %v219_v6 = vpop.f32.mrb[0].mxu1 }
  0xe1   :  { %v220_v7 = vadd.f32 %v219_v6, %v147_v5  ;;  %v221_v8 = vpop.f32.mrb[1].mxu1 }
  0xe2   :  { %v222_v9 = vadd.f32 %v221_v8, %v147_v5 }
  0xe3   :  { %v1970_v10 = vmul.f32 -1.442695, %v220_v7 }
  0xe4   :  { %v1971_v11 = vmul.f32 -1.442695, %v222_v9 }
  0xe5   :  { %2496 = vpow2.f32 %v1970_v10 }
  0xe6   :  { %2498 = vpow2.f32 %v1971_v11 }
  0xe8   :  { %v290_v12 = vpop.f32.mrb[2].mxu1 }
  0xe9   :  { %v291_v13 = vadd.f32 %v290_v12, %v147_v5  ;;  %v292_v14 = vpop.f32.mrb[3].mxu1 }
  0xea   :  { %v293_v15 = vadd.f32 %v292_v14, %v147_v5 }
  0xeb   :  { %v1972_v16 = vmul.f32 -1.442695, %v291_v13 }
  0xec   :  { %v1973_v17 = vmul.f32 -1.442695, %v293_v15 }
  0xed   :  { %2500 = vpow2.f32 %v1972_v16 }
  0xee   :  { %2502 = vpow2.f32 %v1973_v17 }
  0xef   :  { %v2497_v18 = vpop.eup %2496 }
  0xf0   :  { %v2499_v19 = vpop.eup %2498  ;;  %v307_v20 = vadd.f32 1.0, %v2497_v18  ;;  %v2397_v18 = vld [vmem:[%s3115_s5 + $0x100] sm:$0xff]  }
  0xf1   :  { %v308_v21 = vadd.f32 1.0, %v2499_v19 }
  0xf2   :  { %2504 = vrcp.f32 %v307_v20 }
  0xf3   :  { %2506 = vrcp.f32 %v308_v21 }
  0xf7   :  { %v2501_v25 = vpop.eup %2500 }
  0xf8   :  { %v2503_v26 = vpop.eup %2502  ;;  %v309_v27 = vadd.f32 1.0, %v2501_v25  ;;  %v2400_v25 = vld [vmem:[%s3115_s5 + $0x180] sm:$0xff]  }
  0xf9   :  { %v310_v28 = vadd.f32 1.0, %v2503_v26  ;;  %v2401_v26 = vld [vmem:[%s3115_s5 + $0x148] sm:$0xff]  }
  0xfa   :  { %2508 = vrcp.f32 %v309_v27 }
  0xfb   :  { %2510 = vrcp.f32 %v310_v28 }
  0xfc   :  { %v2505_v31 = vpop.eup %2504 }
  0xfd   :  { %v2507_v32 = vpop.eup %2506  ;;  %v319_v33 = vmul.f32 %v2505_v31, %v220_v7  ;;  %v489_v7 = vunpack.c.0.s8 %v488_v60  ;;  %v2430_v60 = vld [vmem:[%s3115_s5 + $0x240] sm:$0xff]  }
  0xfe   :  { %v320_v34 = vmul.f32 %v2507_v32, %v222_v9  ;;  %v2406_v32 = vld [vmem:[%s3115_s5 + $0x150] sm:$0xff]  }
  0xff   :  { %v2774_v8 = vsub.s32 %v489_v7, %v330_v30  ;;  %v2403_v30 = vld [vmem:[%s3115_s5 + $0x108] sm:$0xff]  }
 0x100   :  { %v325_v36 = vcombine.low %v319_v33, %v320_v34  ;;  %v365_v37 = vcombine.high %v319_v33, %v320_v34  ;;  %v2405_v33 = vld [vmem:[%s3115_s5 + $0x188] sm:$0xff]   ;;  %v2408_v34 = vld [vmem:[%s3115_s5 + $0x1d0] sm:$0xff]  }
 0x101   :  { %v2437_v7 = vld [vmem:[%s3115_s5 + $0x2c8] sm:$0xff]  }
 0x102   :  { %v332_v38 = vrot.slane %v325_v36, %v331_v35  ;;  %v372_v39 = vrot.slane %v365_v37, %v331_v35  ;;  %v2410_v36 = vld [vmem:[%s3115_s5 + $0x158] sm:$0xff]   ;;  %v2409_v37 = vld [vmem:[%s3115_s5 + $0x190] sm:$0xff]  }
 0x104   :  { %v2509_v41 = vpop.eup %2508  ;;  %v339_v42 = vrot.slane %v332_v38, %v331_v35  ;;  %v346_v43 = vcombine.high %v332_v38, %v332_v38  ;;  %v379_v44 = vrot.slane %v372_v39, %v331_v35  ;;  %v383_v45 = vcombine.high %v372_v39, %v372_v39  ;;  %v2412_v38 = vld [vmem:[%s3115_s5 + $0x1d8] sm:$0xff]  }
 0x105   :  { %v2511_v46 = vpop.eup %2510  ;;  %v321_v47 = vmul.f32 %v2509_v41, %v291_v13  ;;  %v2411_v39 = vld [vmem:[%s3115_s5 + $0x118] sm:$0xff]  }
 0x106   :  { %345 = vst.msk [vmem:[#allocation2] ss:$2 sm:$0x3] %vm2738_vm3, %v339_v42  ;;  %v353_v48 = vrot.slane %v346_v43, %v331_v35  ;;  %v357_v49 = vcombine.high %v339_v42, %v339_v42  ;;  %382 = vst.msk [vmem:[#allocation2 + $0x10] ss:$2 sm:$0x3] %vm2738_vm3, %v379_v44  ;;  %v390_v50 = vrot.slane %v383_v45, %v331_v35 }
 0x107   :  { %v394_v51 = vcombine.high %v379_v44, %v379_v44  ;;  %v322_v52 = vmul.f32 %v2511_v46, %v293_v15  ;;  %v2413_v41 = vld [vmem:[%s3115_s5 + $0x198] sm:$0xff]   ;;  %v2416_v42 = vld [vmem:[%s3115_s5 + $0x1e0] sm:$0xff]   ;;  %v2418_v44 = vld [vmem:[%s3115_s5 + $0x168] sm:$0xff]  }
 0x108   :  { %356 = vst.msk [vmem:[#allocation2 + $0x4] ss:$2 sm:$0x3] %vm2738_vm3, %v353_v48  ;;  %360 = vst.msk [vmem:[#allocation2 + $0x8] ss:$2 sm:$0x3] %vm2738_vm3, %v357_v49  ;;  %v361_v53 = vcombine.high %v353_v48, %v353_v48  ;;  %v398_v54 = vcombine.high %v390_v50, %v390_v50 }
 0x109   :  { %393 = vst.msk [vmem:[#allocation2 + $0x14] ss:$2 sm:$0x3] %vm2738_vm3, %v390_v50  ;;  %397 = vst.msk [vmem:[#allocation2 + $0x18] ss:$2 sm:$0x3] %vm2738_vm3, %v394_v51  ;;  %v404_v55 = vcombine.low %v321_v47, %v322_v52  ;;  %v441_v56 = vcombine.high %v321_v47, %v322_v52 }
 0x10a   :  { %364 = vst.msk [vmem:[#allocation2 + $0xc] ss:$2 sm:$0x3] %vm2738_vm3, %v361_v53  ;;  %401 = vst.msk [vmem:[#allocation2 + $0x1c] ss:$2 sm:$0x3] %vm2738_vm3, %v398_v54 }
 0x10b   :  { %v411_v57 = vrot.slane %v404_v55, %v331_v35  ;;  %v448_v58 = vrot.slane %v441_v56, %v331_v35  ;;  %v2415_v43 = vld [vmem:[%s3115_s5 + $0x120] sm:$0xff]   ;;  %v2420_v46 = vld [vmem:[%s3115_s5 + $0x1e8] sm:$0xff]   ;;  %v2422_v48 = vld [vmem:[%s3115_s5 + $0x170] sm:$0xff]  }
 0x10c   :  { %v2417_v45 = vld [vmem:[%s3115_s5 + $0x1a0] sm:$0xff]   ;;  %v2419_v47 = vld [vmem:[%s3115_s5 + $0x128] sm:$0xff]   ;;  %v2424_v51 = vld [vmem:[%s3115_s5 + $0x1f0] sm:$0xff]  }
 0x10d   :  { %v418_v61 = vrot.slane %v411_v57, %v331_v35  ;;  %v422_v62 = vcombine.high %v411_v57, %v411_v57  ;;  %v455_v63 = vrot.slane %v448_v58, %v331_v35  ;;  %v459_v0 = vcombine.high %v448_v58, %v448_v58  ;;  %v2421_v50 = vld [vmem:[%s3115_s5 + $0x1a8] sm:$0xff]   ;;  %v2423_v52 = vld [vmem:[%s3115_s5 + $0x130] sm:$0xff]   ;;  %v2426_v54 = vld [vmem:[%s3115_s5 + $0x178] sm:$0xff]  }
 0x10e   :  { %v2425_v55 = vld [vmem:[%s3115_s5 + $0x1b0] sm:$0xff]   ;;  %v2428_v57 = vld [vmem:[%s3115_s5 + $0x1f8] sm:$0xff]  }
 0x10f   :  { %421 = vst.msk [vmem:[#allocation2 + $0x1] ss:$2 sm:$0x3] %vm2738_vm3, %v418_v61  ;;  %v429_v1 = vrot.slane %v422_v62, %v331_v35  ;;  %v433_v2 = vcombine.high %v418_v61, %v418_v61  ;;  %458 = vst.msk [vmem:[#allocation2 + $0x11] ss:$2 sm:$0x3] %vm2738_vm3, %v455_v63  ;;  %v466_v3 = vrot.slane %v459_v0, %v331_v35 }
 0x110   :  { %v470_v4 = vcombine.high %v455_v63, %v455_v63  ;;  %v2407_v35 = vld [vmem:[%s3115_s5 + $0x110] sm:$0xff]   ;;  %v2427_v58 = vld [vmem:[%s3115_s5 + $0x138] sm:$0xff]   ;;  %v2432_v63 = vld [vmem:[%s3115_s5 + $0x2c0] sm:$0xff]  }
 0x111   :  { %432 = vst.msk [vmem:[#allocation2 + $0x5] ss:$2 sm:$0x3] %vm2738_vm3, %v429_v1  ;;  %436 = vst.msk [vmem:[#allocation2 + $0x9] ss:$2 sm:$0x3] %vm2738_vm3, %v433_v2  ;;  %v437_v5 = vcombine.high %v429_v1, %v429_v1  ;;  %v474_v6 = vcombine.high %v466_v3, %v466_v3 }
 0x112   :  { %469 = vst.msk [vmem:[#allocation2 + $0x15] ss:$2 sm:$0x3] %vm2738_vm3, %v466_v3  ;;  %473 = vst.msk [vmem:[#allocation2 + $0x19] ss:$2 sm:$0x3] %vm2738_vm3, %v470_v4 }
 0x113   :  { %440 = vst.msk [vmem:[#allocation2 + $0xd] ss:$2 sm:$0x3] %vm2738_vm3, %v437_v5  ;;  %477 = vst.msk [vmem:[#allocation2 + $0x1d] ss:$2 sm:$0x3] %vm2738_vm3, %v474_v6 }
 0x114   :  { %v2429_v61 = vld [vmem:[%s3115_s5 + $0x1b8] sm:$0xff]   ;;  %v2431_v0 = vld [vmem:[%s3115_s5 + $0x200] sm:$0xff]   ;;  %v2435_v3 = vld [vmem:[%s3115_s5 + $0x248] sm:$0xff]  }
 0x115   :  { %v2433_v5 = vld [vmem:[%s3115_s5 + $0x280] sm:$0xff]  }
 0x118   :  { %v478_v9 = vld [vmem:[#allocation2] sm:$0xff] }
 0x119   :  { %v493_v10 = vrot.slane %v478_v9, %v2774_v8  ;;  %v486_v11 = vcombine.high %v478_v9, %v478_v9  ;;  %v480_v49 = vld [vmem:[#allocation2 + $0x10] sm:$0xff] }
 0x11a   :  { %v479_v12 = vld [vmem:[#allocation2 + $0x8] sm:$0xff]  ;;  %v520_v53 = vcombine.high %v480_v49, %v480_v49  ;;  %v2870_v56 = vrot.slane %v480_v49, %v2774_v8  ;;  %v2466_v49 = vld [vmem:[%s3115_s5 + $0x380] sm:$0xff]  }
 0x11b   :  { %v501_v13 = vcombine.high %v493_v10, %v493_v10  ;;  %v500_v14 = vrot.slane %v486_v11, %v2774_v8  ;;  %v2779_v15 = vrot.slane %v479_v12, %v2774_v8  ;;  %v503_v16 = vcombine.high %v479_v12, %v479_v12  ;;  %v2439_v11 = vld [vmem:[%s3115_s5 + $0x250] sm:$0xff]   ;;  %v2438_v12 = vld [vmem:[%s3115_s5 + $0x288] sm:$0xff]  }
 0x11c   :  { %v570_v21 = vpack.c.bf16 %v493_v10, %v493_v10  ;;  %v2879_v59 = vrot.slane %v520_v53, %v2774_v8  ;;  %v535_v62 = vcombine.high %v2870_v56, %v2870_v56  ;;  %v2436_v10 = vld [vmem:[%s3115_s5 + $0x208] sm:$0xff]  }
 0x11d   :  { %v571_v17 = vpack.c.bf16 %v501_v13, %v501_v13  ;;  %v502_v19 = vcombine.high %v500_v14, %v500_v14  ;;  %v518_v20 = vcombine.high %v2779_v15, %v2779_v15  ;;  %v2787_v22 = vrot.slane %v503_v16, %v2774_v8  ;;  %v2441_v13 = vld [vmem:[%s3115_s5 + $0x2d0] sm:$0xff]   ;;  %v2469_v53 = vld [vmem:[%s3115_s5 + $0x308] sm:$0xff]  }
 0x11e   :  { %v572_v27 = vpack.c.bf16 %v500_v14, %v500_v14  ;;  %v536_v1 = vcombine.high %v2879_v59, %v2879_v59  ;;  %v574_v2 = vpack.c.bf16 %v2779_v15, %v2779_v15  ;;  %v579_v4 = vpack.c.bf16 %v535_v62, %v535_v62  ;;  %v2440_v14 = vld [vmem:[%s3115_s5 + $0x210] sm:$0xff]   ;;  %v2443_v15 = vld [vmem:[%s3115_s5 + $0x258] sm:$0xff]   ;;  %v2480_v62 = vld [vmem:[%s3115_s5 + $0x360] sm:$0xff]  }
 0x11f   :  { %1642 = vmatprep.mubr.bf16.mxu0 %v571_v17  ;;  %v573_v23 = vpack.c.bf16 %v502_v19, %v502_v19  ;;  %v575_v24 = vpack.c.bf16 %v518_v20, %v518_v20  ;;  %v519_v28 = vcombine.high %v2787_v22, %v2787_v22  ;;  %v576_v6 = vpack.c.bf16 %v2787_v22, %v2787_v22  ;;  %v2442_v16 = vld [vmem:[%s3115_s5 + $0x290] sm:$0xff]   ;;  %v2445_v17 = vld [vmem:[%s3115_s5 + $0x2d8] sm:$0xff]   ;;  %v2447_v19 = vld [vmem:[%s3115_s5 + $0x260] sm:$0xff]  }
 0x120   :  { %1643 = vmatmul.mubr.bf16.vlgmr.msra.gmra.mrb[4].mxu0 %v570_v21  ;;  %v581_v9 = vpack.c.bf16 %v536_v1, %v536_v1  ;;  %v2446_v20 = vld [vmem:[%s3115_s5 + $0x298] sm:$0xff]   ;;  %v2449_v21 = vld [vmem:[%s3115_s5 + $0x2e0] sm:$0xff]  }
 0x121   :  { %2176 = vmatpush3.bf16.msra.mxu0 %v2397_v18  ;;  %1682 = vmatprep.mubr.bf16.mxu1 %v573_v23  ;;  %v577_v31 = vpack.c.bf16 %v519_v28, %v519_v28  ;;  %v2444_v18 = vld [vmem:[%s3115_s5 + $0x218] sm:$0xff]   ;;  %v2448_v22 = vld [vmem:[%s3115_s5 + $0x220] sm:$0xff]   ;;  %v2451_v23 = vld [vmem:[%s3115_s5 + $0x268] sm:$0xff]  }
 0x122   :  { %1722 = vmatprep.mubr.bf16.mxu0 %v575_v24  ;;  %1683 = vmatmul.mubr.bf16.vlgmr.msra.gmra.mrb[4].mxu1 %v572_v27  ;;  %v2450_v24 = vld [vmem:[%s3115_s5 + $0x2a0] sm:$0xff]   ;;  %v2455_v27 = vld [vmem:[%s3115_s5 + $0x270] sm:$0xff]   ;;  %v481_v28 = vld [vmem:[#allocation2 + $0x18] sm:$0xff] }
 0x123   :  { %2198 = vmatpush3.bf16.msra.mxu1 %v2400_v25  ;;  %2177 = vmatprep.subr.bf16.mxu0 %v2401_v26  ;;  %v2453_v25 = vld [vmem:[%s3115_s5 + $0x2e8] sm:$0xff]   ;;  %v2481_v1 = vld [vmem:[%s3115_s5 + $0x320] sm:$0xff]  }
 0x124   :  { %1762 = vmatprep.mubr.bf16.mxu1 %v577_v31  ;;  %2199 = vmatprep.subr.bf16.mxu1 %v2404_v29  ;;  %v2452_v26 = vld [vmem:[%s3115_s5 + $0x228] sm:$0xff]   ;;  %v2964_v29 = vpop.f32.mrb[0].mxu0 }
 0x125   :  { %2178 = vmatpush3.bf16.msra.mxu0 %v2403_v30  ;;  %v2454_v30 = vld [vmem:[%s3115_s5 + $0x2a8] sm:$0xff]   ;;  %v2325_v31 = vpop.f32.mrb[1].mxu0 }
 0x126   :  { %2179 = vmatprep.subr.bf16.mxu0 %v2406_v32  ;;  %v2457_v32 = vld [vmem:[%s3115_s5 + $0x2f0] sm:$0xff]  }
 0x127   :  { %2200 = vmatpush3.bf16.msra.mxu1 %v2405_v33  ;;  %v2456_v33 = vld [vmem:[%s3115_s5 + $0x230] sm:$0xff]  }
 0x128   :  { %2201 = vmatprep.subr.bf16.mxu1 %v2408_v34  ;;  %v537_v34 = vcombine.high %v481_v28, %v481_v28 }
 0x129   :  { %2180 = vmatpush3.bf16.msra.mxu0 %v2407_v35  ;;  %v2459_v35 = vld [vmem:[%s3115_s5 + $0x278] sm:$0xff]  }
 0x12a   :  { %2181 = vmatprep.subr.bf16.mxu0 %v2410_v36  ;;  %v2458_v36 = vld [vmem:[%s3115_s5 + $0x2b0] sm:$0xff]  }
 0x12b   :  { %2202 = vmatpush3.bf16.msra.mxu1 %v2409_v37  ;;  %v2982_v37 = vrot.slane %v481_v28, %v2774_v8 }
 0x12c   :  { %2203 = vmatprep.subr.bf16.mxu1 %v2412_v38  ;;  %v2461_v38 = vld [vmem:[%s3115_s5 + $0x2f8] sm:$0xff]  }
 0x12d   :  { %2182 = vmatpush3.bf16.msra.mxu0 %v2411_v39  ;;  %v2460_v39 = vld [vmem:[%s3115_s5 + $0x238] sm:$0xff]  }
 0x12e   :  { %2183 = vmatprep.subr.bf16.mxu0 %v2414_v40  ;;  %v2991_v40 = vrot.slane %v537_v34, %v2774_v8  ;;  %v2464_v8 = vld [vmem:[%s3115_s5 + $0x300] sm:$0xff]  }
 0x12f   :  { %2204 = vmatpush3.bf16.msra.mxu1 %v2413_v41  ;;  %v2463_v41 = vld [vmem:[%s3115_s5 + $0x340] sm:$0xff]  }
 0x130   :  { %2205 = vmatprep.subr.bf16.mxu1 %v2416_v42  ;;  %v2462_v42 = vld [vmem:[%s3115_s5 + $0x2b8] sm:$0xff]  }
 0x131   :  { %2184 = vmatpush3.bf16.msra.mxu0 %v2415_v43  ;;  %v552_v43 = vcombine.high %v2982_v37, %v2982_v37 }
 0x132   :  { %2185 = vmatprep.subr.bf16.mxu0 %v2418_v44  ;;  %v2465_v44 = vld [vmem:[%s3115_s5 + $0x3c0] sm:$0xff]  }
 0x133   :  { %2206 = vmatpush3.bf16.msra.mxu1 %v2417_v45  ;;  %v553_v45 = vcombine.high %v2991_v40, %v2991_v40 }
 0x134   :  { %2207 = vmatprep.subr.bf16.mxu1 %v2420_v46  ;;  %v578_v46 = vpack.c.bf16 %v2870_v56, %v2870_v56  ;;  %v2474_v56 = vld [vmem:[%s3115_s5 + $0x3d0] sm:$0xff]  }
 0x135   :  { %2186 = vmatpush3.bf16.msra.mxu0 %v2419_v47  ;;  %v2468_v47 = vld [vmem:[%s3115_s5 + $0x348] sm:$0xff]  }
 0x136   :  { %2187 = vmatprep.subr.bf16.mxu0 %v2422_v48  ;;  %v583_v48 = vpack.c.bf16 %v552_v43, %v552_v43 }
 0x137   :  { %2208 = vmatpush3.bf16.msra.mxu1 %v2421_v50  ;;  %v580_v50 = vpack.c.bf16 %v2879_v59, %v2879_v59  ;;  %v2475_v59 = vld [vmem:[%s3115_s5 + $0x390] sm:$0xff]  }
 0x138   :  { %2209 = vmatprep.subr.bf16.mxu1 %v2424_v51  ;;  %v2470_v51 = vld [vmem:[%s3115_s5 + $0x3c8] sm:$0xff]  }
 0x139   :  { %2188 = vmatpush3.bf16.msra.mxu0 %v2423_v52  ;;  %v585_v52 = vpack.c.bf16 %v553_v45, %v553_v45 }
 0x13a   :  { %2189 = vmatprep.subr.bf16.mxu0 %v2426_v54  ;;  %v2472_v54 = vld [vmem:[%s3115_s5 + $0x350] sm:$0xff]  }
 0x13b   :  { %2210 = vmatpush3.bf16.msra.mxu1 %v2425_v55  ;;  %v2471_v55 = vld [vmem:[%s3115_s5 + $0x388] sm:$0xff]  }
 0x13c   :  { %2211 = vmatprep.subr.bf16.mxu1 %v2428_v57  ;;  %v2473_v57 = vld [vmem:[%s3115_s5 + $0x310] sm:$0xff]  }
 0x13d   :  { %2190 = vmatpush3.bf16.msra.mxu0 %v2427_v58  ;;  %v2476_v58 = vld [vmem:[%s3115_s5 + $0x358] sm:$0xff]  }
 0x13e   :  { %2219 = vmatprep.subr.bf16.mxu0 %v2430_v60  ;;  %v2478_v60 = vld [vmem:[%s3115_s5 + $0x3d8] sm:$0xff]  }
 0x13f   :  { %2212 = vmatpush3.bf16.msra.mxu1 %v2429_v61  ;;  %v2477_v61 = vld [vmem:[%s3115_s5 + $0x318] sm:$0xff]  }
 0x140   :  { %1723 = vmatmul.mubr.bf16.vlgmr.msra.gmra.mrb[8].mxu0 %v574_v2  ;;  %2241 = vmatprep.subr.bf16.mxu1 %v2432_v63  ;;  %v2479_v63 = vld [vmem:[%s3115_s5 + $0x398] sm:$0xff]   ;;  %v2484_v2 = vld [vmem:[%s3115_s5 + $0x368] sm:$0xff]  }
 0x141   :  { %2220 = vmatpush3.bf16.msra.mxu0 %v2431_v0  ;;  %1802 = vmatprep.mubr.bf16.mxu0 %v579_v4  ;;  %v2482_v0 = vld [vmem:[%s3115_s5 + $0x3e0] sm:$0xff]   ;;  %v2486_v4 = vld [vmem:[%s3115_s5 + $0x3e8] sm:$0xff]  }
 0x142   :  { %1763 = vmatmul.mubr.bf16.vlgmr.msra.gmra.mrb[8].mxu1 %v576_v6  ;;  %2221 = vmatprep.subr.bf16.mxu0 %v2435_v3  ;;  %v2483_v3 = vld [vmem:[%s3115_s5 + $0x3a0] sm:$0xff]   ;;  %v2488_v6 = vld [vmem:[%s3115_s5 + $0x370] sm:$0xff]  }
 0x143   :  { %2242 = vmatpush3.bf16.msra.mxu1 %v2433_v5  ;;  %1842 = vmatprep.mubr.bf16.mxu1 %v581_v9  ;;  %v2485_v5 = vld [vmem:[%s3115_s5 + $0x328] sm:$0xff]   ;;  %v2490_v9 = vld [vmem:[%s3115_s5 + $0x3f0] sm:$0xff]  }
 0x144   :  { %2243 = vmatprep.subr.bf16.mxu1 %v2437_v7  ;;  %v2487_v7 = vld [vmem:[%s3115_s5 + $0x3a8] sm:$0xff]  }
 0x145   :  { %2222 = vmatpush3.bf16.msra.mxu0 %v2436_v10  ;;  %v2489_v10 = vld [vmem:[%s3115_s5 + $0x330] sm:$0xff]  }
 0x146   :  { %2223 = vmatprep.subr.bf16.mxu0 %v2439_v11  ;;  %v2492_v11 = vld [vmem:[%s3115_s5 + $0x378] sm:$0xff]  }
 0x147   :  { %2244 = vmatpush3.bf16.msra.mxu1 %v2438_v12  ;;  %v2491_v12 = vld [vmem:[%s3115_s5 + $0x3b0] sm:$0xff]  }
 0x148   :  { %2245 = vmatprep.subr.bf16.mxu1 %v2441_v13  ;;  %v2494_v13 = vld [vmem:[%s3115_s5 + $0x3f8] sm:$0xff]  }
 0x149   :  { %2224 = vmatpush3.bf16.msra.mxu0 %v2440_v14  ;;  %v2493_v14 = vld [vmem:[%s3115_s5 + $0x338] sm:$0xff]  }
 0x14a   :  { %2225 = vmatprep.subr.bf16.mxu0 %v2443_v15  ;;  %v2495_v15 = vld [vmem:[%s3115_s5 + $0x3b8] sm:$0xff]  }
 0x14b   :  { %2246 = vmatpush3.bf16.msra.mxu1 %v2442_v16  ;;  %v582_v16 = vpack.c.bf16 %v2982_v37, %v2982_v37 }
 0x14c   :  { %2247 = vmatprep.subr.bf16.mxu1 %v2445_v17  ;;  %v584_v17 = vpack.c.bf16 %v2991_v40, %v2991_v40 }
 0x14d   :  { %2226 = vmatpush3.bf16.msra.mxu0 %v2444_v18 }
 0x14e   :  { %2227 = vmatprep.subr.bf16.mxu0 %v2447_v19 }
 0x14f   :  { %2248 = vmatpush3.bf16.msra.mxu1 %v2446_v20 }
 0x150   :  { %2249 = vmatprep.subr.bf16.mxu1 %v2449_v21 }
 0x151   :  { %2228 = vmatpush3.bf16.msra.mxu0 %v2448_v22 }
 0x152   :  { %2229 = vmatprep.subr.bf16.mxu0 %v2451_v23 }
 0x153   :  { %2250 = vmatpush3.bf16.msra.mxu1 %v2450_v24 }
 0x154   :  { %2251 = vmatprep.subr.bf16.mxu1 %v2453_v25 }
 0x155   :  { %2230 = vmatpush3.bf16.msra.mxu0 %v2452_v26 }
 0x156   :  { %2231 = vmatprep.subr.bf16.mxu0 %v2455_v27 }
 0x157   :  { %2252 = vmatpush3.bf16.msra.mxu1 %v2454_v30 }
 0x158   :  { %2253 = vmatprep.subr.bf16.mxu1 %v2457_v32 }
 0x159   :  { %2232 = vmatpush3.bf16.msra.mxu0 %v2456_v33 }
 0x15a   :  { %2233 = vmatprep.subr.bf16.mxu0 %v2459_v35 }
 0x15b   :  { %2254 = vmatpush3.bf16.msra.mxu1 %v2458_v36 }
 0x15c   :  { %2255 = vmatprep.subr.bf16.mxu1 %v2461_v38 }
 0x15d   :  { %2234 = vmatpush3.bf16.msra.mxu0 %v2460_v39 }
 0x15e   :  { %2263 = vmatprep.subr.bf16.mxu0 %v2463_v41 }
 0x15f   :  { %2256 = vmatpush3.bf16.msra.mxu1 %v2462_v42 }
 0x160   :  { %1803 = vmatmul.mubr.bf16.vlgmr.msra.gmra.mrb[12].mxu0 %v578_v46  ;;  %2285 = vmatprep.subr.bf16.mxu1 %v2465_v44 }
 0x161   :  { %2264 = vmatpush3.bf16.msra.mxu0 %v2464_v8  ;;  %1882 = vmatprep.mubr.bf16.mxu0 %v583_v48 }
 0x162   :  { %1843 = vmatmul.mubr.bf16.vlgmr.msra.gmra.mrb[12].mxu1 %v580_v50  ;;  %2265 = vmatprep.subr.bf16.mxu0 %v2468_v47 }
 0x163   :  { %2286 = vmatpush3.bf16.msra.mxu1 %v2466_v49  ;;  %1922 = vmatprep.mubr.bf16.mxu1 %v585_v52 }
 0x164   :  { %2287 = vmatprep.subr.bf16.mxu1 %v2470_v51 }
 0x165   :  { %2266 = vmatpush3.bf16.msra.mxu0 %v2469_v53 }
 0x166   :  { %2267 = vmatprep.subr.bf16.mxu0 %v2472_v54 }
 0x167   :  { %2288 = vmatpush3.bf16.msra.mxu1 %v2471_v55 }
 0x168   :  { %2289 = vmatprep.subr.bf16.mxu1 %v2474_v56 }
 0x169   :  { %2268 = vmatpush3.bf16.msra.mxu0 %v2473_v57 }
 0x16a   :  { %2269 = vmatprep.subr.bf16.mxu0 %v2476_v58  ;;  %v1966_v58 = vld [vmem:[%s3117_s6] ss:$0 sm:$0xff]  ;;  %s2526_s6 = smov 64  }
 0x16b   :  { %2290 = vmatpush3.bf16.msra.mxu1 %v2475_v59 }
 0x16c   :  { %2291 = vmatprep.subr.bf16.mxu1 %v2478_v60 }
 0x16d   :  { %2270 = vmatpush3.bf16.msra.mxu0 %v2477_v61 }
 0x16e   :  { %2271 = vmatprep.subr.bf16.mxu0 %v2480_v62 }
 0x16f   :  { %2292 = vmatpush3.bf16.msra.mxu1 %v2479_v63 }
 0x170   :  { %2293 = vmatprep.subr.bf16.mxu1 %v2482_v0 }
 0x171   :  { %2272 = vmatpush3.bf16.msra.mxu0 %v2481_v1  ;;  %v122_v1 = vadd.f32 %v1966_v58, %v2964_v29 }
 0x172   :  { %2273 = vmatprep.subr.bf16.mxu0 %v2484_v2 }
 0x173   :  { %2294 = vmatpush3.bf16.msra.mxu1 %v2483_v3 }
 0x174   :  { %2295 = vmatprep.subr.bf16.mxu1 %v2486_v4 }
 0x175   :  { %2274 = vmatpush3.bf16.msra.mxu0 %v2485_v5 }
 0x176   :  { %2275 = vmatprep.subr.bf16.mxu0 %v2488_v6 }
 0x177   :  { %2296 = vmatpush3.bf16.msra.mxu1 %v2487_v7 }
 0x178   :  { %2297 = vmatprep.subr.bf16.mxu1 %v2490_v9 }
 0x179   :  { %2276 = vmatpush3.bf16.msra.mxu0 %v2489_v10 }
 0x17a   :  { %2277 = vmatprep.subr.bf16.mxu0 %v2492_v11 }
 0x17b   :  { %2298 = vmatpush3.bf16.msra.mxu1 %v2491_v12 }
 0x17c   :  { %2299 = vmatprep.subr.bf16.mxu1 %v2494_v13 }
 0x17d   :  { %2278 = vmatpush3.bf16.msra.mxu0 %v2493_v14 }
 0x17f   :  { %2300 = vmatpush3.bf16.msra.mxu1 %v2495_v15 }
 0x180   :  { %1883 = vmatmul.mubr.bf16.vlgmr.msra.gmra.mrb[16].mxu0 %v582_v16 }
 0x182   :  { %1923 = vmatmul.mubr.bf16.vlgmr.msra.gmra.mrb[16].mxu1 %v584_v17 }
 0x1f3   :  { %v2147_v18 = vpop.f32.mrb[4].mxu0 }
 0x1f4   :  { %v2148_v19 = vpop.f32.mrb[5].mxu0 }
 0x1f5   :  { %v2149_v20 = vadd.f32 %v2148_v19, %v2147_v18  ;;  %v2150_v21 = vpop.f32.mrb[6].mxu0  ;;  %v2169_v22 = vpop.f32.mrb[4].mxu1 }
 0x1f6   :  { %v2151_v23 = vpop.f32.mrb[7].mxu0  ;;  %v2170_v24 = vpop.f32.mrb[5].mxu1 }
 0x1f7   :  { %v2171_v25 = vadd.f32 %v2170_v24, %v2169_v22  ;;  %v2172_v26 = vpop.f32.mrb[6].mxu1 }
 0x1f8   :  { %v2173_v27 = vpop.f32.mrb[7].mxu1 }
 0x1f9   :  { %v1685_v28 = vadd.f32 %v2171_v25, %v2149_v20 }
 0x213   :  { %v2191_v30 = vpop.f32.mrb[8].mxu0 }
 0x214   :  { %v2192_v31 = vpop.f32.mrb[9].mxu0 }
 0x215   :  { %v2193_v32 = vadd.f32 %v2192_v31, %v2191_v30  ;;  %v2194_v33 = vpop.f32.mrb[10].mxu0  ;;  %v2213_v34 = vpop.f32.mrb[8].mxu1 }
 0x216   :  { %v2195_v35 = vpop.f32.mrb[11].mxu0  ;;  %v2214_v36 = vpop.f32.mrb[9].mxu1 }
 0x217   :  { %v1725_v37 = vadd.f32 %v2193_v32, %v1685_v28  ;;  %v2215_v38 = vadd.f32 %v2214_v36, %v2213_v34  ;;  %v2216_v39 = vpop.f32.mrb[10].mxu1 }
 0x218   :  { %v2217_v40 = vpop.f32.mrb[11].mxu1 }
 0x219   :  { %v1765_v41 = vadd.f32 %v2215_v38, %v1725_v37 }
 0x233   :  { %v2235_v42 = vpop.f32.mrb[12].mxu0 }
 0x234   :  { %v2236_v43 = vpop.f32.mrb[13].mxu0 }
 0x235   :  { %v2237_v44 = vadd.f32 %v2236_v43, %v2235_v42  ;;  %v2238_v8 = vpop.f32.mrb[14].mxu0  ;;  %v2257_v45 = vpop.f32.mrb[12].mxu1 }
 0x236   :  { %v2239_v46 = vpop.f32.mrb[15].mxu0  ;;  %v2258_v47 = vpop.f32.mrb[13].mxu1 }
 0x237   :  { %v1805_v48 = vadd.f32 %v2237_v44, %v1765_v41  ;;  %v2259_v49 = vadd.f32 %v2258_v47, %v2257_v45  ;;  %v2260_v50 = vpop.f32.mrb[14].mxu1 }
 0x238   :  { %v2261_v51 = vpop.f32.mrb[15].mxu1 }
 0x239   :  { %v1845_v52 = vadd.f32 %v2259_v49, %v1805_v48 }
 0x253   :  { %v2279_v53 = vpop.f32.mrb[16].mxu0 }
 0x254   :  { %v2280_v54 = vpop.f32.mrb[17].mxu0 }
 0x255   :  { %v2281_v55 = vadd.f32 %v2280_v54, %v2279_v53  ;;  %v2282_v56 = vpop.f32.mrb[18].mxu0  ;;  %v2301_v57 = vpop.f32.mrb[16].mxu1 }
 0x256   :  { %v2283_v59 = vpop.f32.mrb[19].mxu0  ;;  %v2302_v60 = vpop.f32.mrb[17].mxu1 }
 0x257   :  { %v1885_v61 = vadd.f32 %v2281_v55, %v1845_v52  ;;  %v2303_v62 = vadd.f32 %v2302_v60, %v2301_v57  ;;  %v2304_v63 = vpop.f32.mrb[18].mxu1 }
 0x258   :  { %v2305_v0 = vpop.f32.mrb[19].mxu1 }
 0x259   :  { %v1925_v2 = vadd.f32 %v2303_v62, %v1885_v61 }
 0x25b   :  { %v1930_v3 = vadd.f32 %v1925_v2, %v122_v1 }
 0x25d   :  { %1934 = vrot.lane.b32.xlu0 %v1930_v3, %s2524_s4  ;;  %2512 = vtanh.f32 %v1930_v3  ;;  %v1932_v5 = vsub.f32 0.0, %v1930_v3 }
 0x267   :  { %v2513_v4 = vpop.eup %2512 }
 0x268   :  { %1951 = vrot.lane.b32.xlu1 %v2513_v4, %s2525_s26 }
 0x2cf   :  { %v1935_v6 = vpop.permute.xlu0 %1934 }
 0x2d0   :  { %v1937_v7 = vadd.f32 %v1935_v6, %v1932_v5 }
 0x2d2   :  { %v2102_v9 = vmul.f32 -1.442695, %v1937_v7 }
 0x2d4   :  { %2514 = vpow2.f32 %v2102_v9 }
 0x2da   :  { %v1952_v13 = vpop.permute.xlu1 %1951 }
 0x2de   :  { %v2515_v10 = vpop.eup %2514 }
 0x2df   :  { %v1941_v11 = vadd.f32 1.0, %v2515_v10 }
 0x2e1   :  { %2516 = vrcp.f32 %v1941_v11 }
 0x2eb   :  { %v2517_v12 = vpop.eup %2516 }
 0x2ec   :  { %v1954_v14 = vmul.f32 %v2517_v12, %v1952_v13  ;;  %v1944_v29 = vsub.f32 1.0, %v2517_v12 }
 0x2ee   :  { %1946 = vrot.lane.b32.xlu1 %v1944_v29, %s2526_s6  ;;  %1956 = vrot.lane.b32.xlu0 %v1954_v14, %s2526_s6 }
 0x360   :  { %v1947_v15 = vpop.permute.xlu1 %1946  ;;  %v1957_v17 = vpop.permute.xlu0 %1956 }
 0x361   :  { %v1949_v16 = vmul.f32 %v2513_v4, %v1947_v15 }
 0x363   :  { %v1959_v18 = vadd.f32 %v1957_v17, %v1949_v16 }
 0x365   :  { %1961 = vst.msk [vmem:[%s3118_s7] sm:$0x3] %vm1960_vm4, %v1959_v18 }

</bundles_post_ra>
